<compile_context>
chip_gen: v7x
topology: tpu7x:2x2x1
jax: 0.10.0
libtpu: 0.0.40
codegen_flags: <defaults>
</compile_context>

<pallas_src>
import functools

import jax
import jax.numpy as jnp
from jax.experimental import pallas as pl
from jax.experimental.pallas import tpu as pltpu

BN_EPS = 1e-5
LANE_PAD = 128      # all per-layer output dims padded to one full lane width
SUBLANE = 8         # f32 sublane granularity
MAX_BATCH_TILE = 512  # >=512-row tiles reach ~85% of HBM roofline when batch is large


def _round_up(n, m):
    return ((n + m - 1) // m) * m


# ---------------------------------------------------------------------------
# Kernel: x -> relu(x@W1'+b1') -> relu(.@W2'+b2') -> .@W3+b3  (all lane-dense)
# ---------------------------------------------------------------------------
def _mlp_kernel(x_ref, w1_ref, w2_ref, w3_ref, bias_ref, out_ref):
    x = x_ref[...]

    # fc1 (+ folded bn1) + relu   (dropout1 == identity in eval mode)
    h1 = jnp.dot(x, w1_ref[...], preferred_element_type=jnp.float32) + bias_ref[0:1, :]
    h1 = jnp.maximum(h1, 0.0)

    # fc2 (+ folded bn2) + relu   (dropout2 == identity in eval mode)
    h2 = jnp.dot(h1, w2_ref[...], preferred_element_type=jnp.float32) + bias_ref[1:2, :]
    h2 = jnp.maximum(h2, 0.0)

    # fc3 (padded to 128 output lanes -> unmasked full-vreg store)
    out = jnp.dot(h2, w3_ref[...], preferred_element_type=jnp.float32) + bias_ref[2:3, :]
    out_ref[...] = out.astype(out_ref.dtype)


# ---------------------------------------------------------------------------
# Wrapper (jitted: padding + kernel + final slice fuse into one dispatch)
# ---------------------------------------------------------------------------
@functools.partial(jax.jit, static_argnames=("n_labels",))
def classification_model_forward(x, prepared, n_labels):
    """Fused forward pass. `prepared` comes from `fold_and_pad_params` (done once)."""
    batch, n_features = x.shape
    kp = prepared["w1"].shape[0]   # padded feature (contraction) dim, multiple of 8
    lp = prepared["w3"].shape[1]   # padded label dim (128)

    # Batch tiling: one sublane-aligned tile for small batches, 512-row tiles
    # (auto double-buffered, weights stay VMEM-resident) for large batches.
    tb = min(MAX_BATCH_TILE, _round_up(max(batch, 1), SUBLANE))
    padded_batch = _round_up(batch, tb)

    # Input padding fuses with the caller under jit (no extra dispatch).
    xp = jnp.pad(x, ((0, padded_batch - batch), (0, kp - n_features)))

    grid = (padded_batch // tb,)

    out = pl.pallas_call(
        _mlp_kernel,
        out_shape=jax.ShapeDtypeStruct((padded_batch, lp), jnp.float32),
        grid=grid,
        in_specs=[
            pl.BlockSpec((tb, kp), lambda i: (i, 0)),        # x: tiled over batch
            pl.BlockSpec((kp, lp), lambda i: (0, 0)),        # w1: constant -> resident
            pl.BlockSpec((lp, lp), lambda i: (0, 0)),        # w2: constant -> resident
            pl.BlockSpec((lp, lp), lambda i: (0, 0)),        # w3: constant -> resident
            pl.BlockSpec((SUBLANE, lp), lambda i: (0, 0)),   # bias slab: constant
        ],
        out_specs=pl.BlockSpec((tb, lp), lambda i: (i, 0)),
        compiler_params=pltpu.CompilerParams(
            dimension_semantics=("parallel",)),              # v7x: 2 TCs split batch
    )(xp, prepared["w1"], prepared["w2"], prepared["w3"], prepared["bias"])

    # Slice fuses under jit; padded logit columns are exactly 0.0 and dropped here.
    return out[:batch, :n_labels]


# ---------------------------------------------------------------------------
# Parameter preparation (done ONCE, outside the forward path)
# ---------------------------------------------------------------------------
def fold_and_pad_params(p):
    """Fold BN into the preceding Linear layers and zero-pad for TPU alignment."""

    def pad_cols(a, n):
        return jnp.pad(a, ((0, 0), (0, n - a.shape[1])))

    def pad_rows(a, n):
        return jnp.pad(a, ((0, n - a.shape[0]), (0, 0)))

    # Fold bn1 into fc1
    s1 = p["g1"] * jax.lax.rsqrt(p["v1"] + BN_EPS)            # (1, H1)
    w1f = p["w1"] * s1                                        # (F, H1)
    b1f = (p["b1"] - p["m1"]) * s1 + p["be1"]                 # (1, H1)

    # Fold bn2 into fc2
    s2 = p["g2"] * jax.lax.rsqrt(p["v2"] + BN_EPS)            # (1, H2)
    w2f = p["w2"] * s2                                        # (H1, H2)
    b2f = (p["b2"] - p["m2"]) * s2 + p["be2"]                 # (1, H2)

    # Zero-pad: output dims to 128 lanes, w1's contraction dim to a multiple of
    # 8 sublanes.  Padding is exact: padded biases are 0, relu(0) = 0, padded
    # weight rows are 0, padded x columns are 0.
    kp = _round_up(p["w1"].shape[0], SUBLANE)                 # e.g. 13 -> 16
    w1p = pad_rows(pad_cols(w1f, LANE_PAD), kp)               # (16, 128)
    w2p = pad_cols(pad_rows(w2f, LANE_PAD), LANE_PAD)         # (128, 128)
    w3p = pad_cols(pad_rows(p["w3"], LANE_PAD), LANE_PAD)     # (128, 128)

    bias = jnp.concatenate(
        [pad_cols(b1f, LANE_PAD), pad_cols(b2f, LANE_PAD), pad_cols(p["b3"], LANE_PAD)],
        axis=0,
    )                                                         # (3, 128)
    bias = pad_rows(bias, SUBLANE)                            # (8, 128) sublane-aligned

    return dict(w1=w1p, w2=w2p, w3=w3p, bias=bias)


def init_params(key, n_features, n_hidden1, n_hidden2, n_labels):
    """Deterministic synthetic parameters matching the PyTorch module shapes."""
    ks = jax.random.split(key, 9)

    def linear(kw, kb, fan_in, fan_out):
        bound = 1.0 / jnp.sqrt(fan_in)
        w = jax.random.uniform(kw, (fan_in, fan_out), jnp.float32, -bound, bound)
        b = jax.random.uniform(kb, (1, fan_out), jnp.float32, -bound, bound)
        return w, b

    w1, b1 = linear(ks[0], ks[1], n_features, n_hidden1)
    w2, b2 = linear(ks[2], ks[3], n_hidden1, n_hidden2)
    w3, b3 = linear(ks[4], ks[5], n_hidden2, n_labels)

    g1 = jnp.ones((1, n_hidden1), jnp.float32)
    be1 = jnp.zeros((1, n_hidden1), jnp.float32)
    m1 = 0.1 * jax.random.normal(ks[6], (1, n_hidden1), jnp.float32)
    v1 = 1.0 + 0.1 * jnp.abs(jax.random.normal(ks[7], (1, n_hidden1), jnp.float32))

    g2 = jnp.ones((1, n_hidden2), jnp.float32)
    be2 = jnp.zeros((1, n_hidden2), jnp.float32)
    m2 = 0.1 * jax.random.normal(ks[8], (1, n_hidden2), jnp.float32)
    v2 = jnp.ones((1, n_hidden2), jnp.float32)

    return dict(
        w1=w1, b1=b1, g1=g1, be1=be1, m1=m1, v1=v1,
        w2=w2, b2=b2, g2=g2, be2=be2, m2=m2, v2=v2,
        w3=w3, b3=b3,
    )


def _reference_forward(x, p):
    """Pure-JAX reference (unfolded BN, eval-mode dropout) for correctness checking."""
    h1 = x @ p["w1"] + p["b1"]
    h1 = p["g1"] * (h1 - p["m1"]) / jnp.sqrt(p["v1"] + BN_EPS) + p["be1"]
    h1 = jnp.maximum(h1, 0.0)
    h2 = h1 @ p["w2"] + p["b2"]
    h2 = p["g2"] * (h2 - p["m2"]) / jnp.sqrt(p["v2"] + BN_EPS) + p["be2"]
    h2 = jnp.maximum(h2, 0.0)
    return h2 @ p["w3"] + p["b3"]


if __name__ == "__main__":
    # Wine dataset-like dimensions: 13 features, 3 classes; small hidden sizes.
    batch, n_features, n_hidden1, n_hidden2, n_labels = 8, 13, 32, 16, 3

    key = jax.random.PRNGKey(0)
    k_x, k_p = jax.random.split(key)

    x = jax.random.normal(k_x, (batch, n_features), jnp.float32)
    params = init_params(k_p, n_features, n_hidden1, n_hidden2, n_labels)

    # BN folding + alignment padding happens ONCE here (inference constants).
    prepared = fold_and_pad_params(params)

    logits = classification_model_forward(x, prepared, n_labels)
    jax.block_until_ready(logits)

    ref = _reference_forward(x, params)
    assert logits.shape == (batch, n_labels)
    assert jnp.allclose(logits, ref, atol=1e-4, rtol=1e-4), "mismatch vs reference"

    print("KERNEL_OK")
</pallas_src>

<mosaic_0001>
module attributes {stable_mosaic.version = 11 : i64} {
  func.func @_mlp_kernel(%arg0: i32, %arg1: memref<8x16xf32, #tpu.memory_space<vmem>>, %arg2: memref<16x128xf32, #tpu.memory_space<vmem>>, %arg3: memref<128x128xf32, #tpu.memory_space<vmem>>, %arg4: memref<128x128xf32, #tpu.memory_space<vmem>>, %arg5: memref<8x128xf32, #tpu.memory_space<vmem>>, %arg6: memref<8x128xf32, #tpu.memory_space<vmem>>) attributes {dimension_semantics = [#tpu.dimension_semantics<parallel>], iteration_bounds = array<i64: 1>, scalar_prefetch = 0 : i64, scratch_operands = 0 : i64, tpu.core_type = #tpu.core_type<tc>, window_params = [{transform_indices = @transform_0, window_bounds = array<i64: 8, 16>}, {pipeline_mode = #tpu.pipeline_mode<synchronous>, transform_indices = @transform_1, window_bounds = array<i64: 16, 128>}, {pipeline_mode = #tpu.pipeline_mode<synchronous>, transform_indices = @transform_2, window_bounds = array<i64: 128, 128>}, {pipeline_mode = #tpu.pipeline_mode<synchronous>, transform_indices = @transform_3, window_bounds = array<i64: 128, 128>}, {pipeline_mode = #tpu.pipeline_mode<synchronous>, transform_indices = @transform_4, window_bounds = array<i64: 8, 128>}, {transform_indices = @transform_5, window_bounds = array<i64: 8, 128>}]} {
    %c0 = arith.constant 0 : index
    %c0_0 = arith.constant 0 : index
    %0 = vector.load %arg1[%c0, %c0_0] : memref<8x16xf32, #tpu.memory_space<vmem>>, vector<8x16xf32>
    %c0_1 = arith.constant 0 : index
    %c0_2 = arith.constant 0 : index
    %1 = vector.load %arg2[%c0_1, %c0_2] : memref<16x128xf32, #tpu.memory_space<vmem>>, vector<16x128xf32>
    %cst = arith.constant dense<0.000000e+00> : vector<8x128xf32>
    %2 = tpu.matmul %0, %1, %cst {dimension_numbers = #tpu.dot_dimension_numbers<[1], [0], [0], [1], [0, 0, 1, 1], [], []>} : vector<8x16xf32>, vector<16x128xf32>, vector<8x128xf32> -> vector<8x128xf32>
    %c0_3 = arith.constant 0 : index
    %c0_4 = arith.constant 0 : index
    %3 = vector.load %arg5[%c0_3, %c0_4] : memref<8x128xf32, #tpu.memory_space<vmem>>, vector<1x128xf32>
    %4 = vector.broadcast %3 : vector<1x128xf32> to vector<8x128xf32>
    %5 = arith.addf %2, %4 : vector<8x128xf32>
    %cst_5 = arith.constant 0.000000e+00 : f32
    %6 = vector.broadcast %cst_5 : f32 to vector<8x128xf32>
    %7 = arith.maximumf %5, %6 : vector<8x128xf32>
    %c0_6 = arith.constant 0 : index
    %c0_7 = arith.constant 0 : index
    %8 = vector.load %arg3[%c0_6, %c0_7] : memref<128x128xf32, #tpu.memory_space<vmem>>, vector<128x128xf32>
    %cst_8 = arith.constant dense<0.000000e+00> : vector<8x128xf32>
    %9 = tpu.matmul %7, %8, %cst_8 {dimension_numbers = #tpu.dot_dimension_numbers<[1], [0], [0], [1], [0, 0, 1, 1], [], []>} : vector<8x128xf32>, vector<128x128xf32>, vector<8x128xf32> -> vector<8x128xf32>
    %c1 = arith.constant 1 : index
    %c0_9 = arith.constant 0 : index
    %10 = vector.load %arg5[%c1, %c0_9] : memref<8x128xf32, #tpu.memory_space<vmem>>, vector<1x128xf32>
    %11 = vector.broadcast %10 : vector<1x128xf32> to vector<8x128xf32>
    %12 = arith.addf %9, %11 : vector<8x128xf32>
    %cst_10 = arith.constant 0.000000e+00 : f32
    %13 = vector.broadcast %cst_10 : f32 to vector<8x128xf32>
    %14 = arith.maximumf %12, %13 : vector<8x128xf32>
    %c0_11 = arith.constant 0 : index
    %c0_12 = arith.constant 0 : index
    %15 = vector.load %arg4[%c0_11, %c0_12] : memref<128x128xf32, #tpu.memory_space<vmem>>, vector<128x128xf32>
    %cst_13 = arith.constant dense<0.000000e+00> : vector<8x128xf32>
    %16 = tpu.matmul %14, %15, %cst_13 {dimension_numbers = #tpu.dot_dimension_numbers<[1], [0], [0], [1], [0, 0, 1, 1], [], []>} : vector<8x128xf32>, vector<128x128xf32>, vector<8x128xf32> -> vector<8x128xf32>
    %c2 = arith.constant 2 : index
    %c0_14 = arith.constant 0 : index
    %17 = vector.load %arg5[%c2, %c0_14] : memref<8x128xf32, #tpu.memory_space<vmem>>, vector<1x128xf32>
    %18 = vector.broadcast %17 : vector<1x128xf32> to vector<8x128xf32>
    %19 = arith.addf %16, %18 : vector<8x128xf32>
    %c0_15 = arith.constant 0 : index
    %c0_16 = arith.constant 0 : index
    %20 = vector.load %arg6[%c0_15, %c0_16] : memref<8x128xf32, #tpu.memory_space<vmem>>, vector<8x128xf32>
    tpu.vector_store %arg6[%c0_15, %c0_16], %19 {strides = array<i32>} : memref<8x128xf32, #tpu.memory_space<vmem>>, vector<8x128xf32>,
    return
  }
  func.func @transform_0(%arg0: i32) -> (i32, i32) {
    %c0_i32 = arith.constant 0 : i32
    %c0_i32_0 = arith.constant 0 : i32
    return %arg0, %c0_i32 : i32, i32
  }
  func.func @transform_1(%arg0: i32) -> (i32, i32) {
    %c0_i32 = arith.constant 0 : i32
    %c0_i32_0 = arith.constant 0 : i32
    %c0_i32_1 = arith.constant 0 : i32
    return %c0_i32, %c0_i32_0 : i32, i32
  }
  func.func @transform_2(%arg0: i32) -> (i32, i32) {
    %c0_i32 = arith.constant 0 : i32
    %c0_i32_0 = arith.constant 0 : i32
    %c0_i32_1 = arith.constant 0 : i32
    return %c0_i32, %c0_i32_0 : i32, i32
  }
  func.func @transform_3(%arg0: i32) -> (i32, i32) {
    %c0_i32 = arith.constant 0 : i32
    %c0_i32_0 = arith.constant 0 : i32
    %c0_i32_1 = arith.constant 0 : i32
    return %c0_i32, %c0_i32_0 : i32, i32
  }
  func.func @transform_4(%arg0: i32) -> (i32, i32) {
    %c0_i32 = arith.constant 0 : i32
    %c0_i32_0 = arith.constant 0 : i32
    %c0_i32_1 = arith.constant 0 : i32
    return %c0_i32, %c0_i32_0 : i32, i32
  }
  func.func @transform_5(%arg0: i32) -> (i32, i32) {
    %c0_i32 = arith.constant 0 : i32
    %c0_i32_0 = arith.constant 0 : i32
    return %arg0, %c0_i32 : i32, i32
  }
}

</mosaic_0001>

<bundles_post_ra>
// kernel: classification_model_forward.1
= control target key start
LH: loop header
LB: loop body
LE: loop exit
PB: predicated region body
PF: predicated region fallthrough
CT: control target
= control target key end

     0   :  { %10 = vsyncpa [#allocation3], 0  ;;  %s647_s0 = inlined_call_operand.vmem [shape: f32[8,16], index: 0, kind: input, shape index: {}]   ;;  %s648_s1 = inlined_call_operand.vmem [shape: f32[16,128], index: 1, kind: input, shape index: {}]   ;;  %s649_s2 = inlined_call_operand.hbm [shape: f32[128,128], index: 2, kind: input, shape index: {}]   ;;  %s650_s3 = inlined_call_operand.hbm [shape: f32[128,128], index: 3, kind: input, shape index: {}]   ;;  %s651_s4 = inlined_call_operand.vmem [shape: f32[8,128], index: 4, kind: input, shape index: {}]   ;;  %s652_s5 = inlined_call_operand.vmem [shape: f32[8,128], index: 5, kind: output, shape index: {}]  }
   0x1   :  { %11 = vsyncpa [#allocation5], 0  ;;  %s545_s18 = smov [#allocation2]   ;;  %s497_s22 = scalar_lea.hbm %s649_s2, 2048 }
   0x2   :  { %s21_s19 = sshll.u32 %s545_s18, 4  ;;  %p498_p0 = scmp.ne.s32.totalorder %s649_s2, %s497_s22  ;;  %s22_s19 = int_to_ptr.vmem [resolvable:$true] %s21_s19 }
   0x3   :  { %p501_p1 = scmp.lt.u32.totalorder %s497_s22, %s649_s2 }
   0x5   :  { %p503_p2 = pnand %p501_p1, %p498_p0 }
   0x7   :  { %506 = shalt.err (!%p503_p2)
}
   0x8   :  { %s507_s27 = scalar_lea.vmem %s22_s19, 2048  ;;  %p512_p4 = scmp.lt.s32.totalorder %s22_s19, %s22_s19 }
   0x9   :  { %p508_p3 = scmp.ne.s32.totalorder %s22_s19, %s507_s27  ;;  %p513_p5 = scmp.lt.s32.totalorder %s507_s27, %s507_s27 }
   0xb   :  { %p514_p6 = por %p513_p5, %p512_p4 }
   0xd   :  { %p515_p7 = pnand %p514_p6, %p508_p3 }
   0xf   :  { %518 = shalt.err (!%p515_p7)
}
  0x10   :  { %s546_s28 = smov 128   ;;  %s547_s29 = smov 8  }
  0x11   :  { %27 = dma.hbm_to_vmem [thread:$0]  %s649_s2, 2048, %s22_s19, [#allocation3], %s546_s28, %s546_s28, %s547_s29  }
  0x12   :  { %s548_s7 = smov [#allocation4]   ;;  %s519_s11 = scalar_lea.hbm %s650_s3, 2048 }
  0x13   :  { %s33_s8 = sshll.u32 %s548_s7, 4  ;;  %p520_p8 = scmp.ne.s32.totalorder %s650_s3, %s519_s11  ;;  %s34_s8 = int_to_ptr.vmem [resolvable:$true] %s33_s8 }
  0x14   :  { %p523_p9 = scmp.lt.u32.totalorder %s519_s11, %s650_s3 }
  0x16   :  { %p525_p10 = pnand %p523_p9, %p520_p8 }
  0x18   :  { %528 = shalt.err (!%p525_p10)
}
  0x19   :  { %s529_s16 = scalar_lea.vmem %s34_s8, 2048  ;;  %p534_p12 = scmp.lt.s32.totalorder %s34_s8, %s34_s8 }
  0x1a   :  { %p530_p11 = scmp.ne.s32.totalorder %s34_s8, %s529_s16  ;;  %p535_p13 = scmp.lt.s32.totalorder %s529_s16, %s529_s16 }
  0x1c   :  { %p536_p0 = por %p535_p13, %p534_p12 }
  0x1e   :  { %p537_p1 = pnand %p536_p0, %p530_p11 }
  0x20   :  { %540 = shalt.err (!%p537_p1)
}
  0x21   :  { %39 = dma.hbm_to_vmem [thread:$0]  %s650_s3, 2048, %s34_s8, [#allocation5], %s546_s28, %s546_s28, %s547_s29  }
  0x22   :  { %541 = dma.done.wait [#allocation3], 2048  }
  0x23   :  { %542 = vsyncadd [#allocation3], 4294965248 }
  0x24   :  { %543 = dma.done.wait [#allocation5], 2048  }
  0x25   :  { %544 = vsyncadd [#allocation5], 4294965248  ;;  %v549_v0 = vmov 0.0|0.0   ;;  %vm550_vm0 = vmmov 0   ;;  %v551_v1 = vmov 0.0   ;;  %v49_v2 = vld [vmem:[%s648_s1] sm:$0xff] }
  0x26   :  { %439 = vmatprep.subr.bf16.mxu0 %v549_v0  ;;  %366 = vmatprep.mubr.msk.f32.mxu0 %vm550_vm0, %v551_v1  ;;  %v50_v3 = vld [vmem:[%s648_s1 + $0x8] sm:$0xff]  ;;  %v131_v5 = vld [vmem:[#allocation2] sm:$0xff]  ;;  %v132_v6 = vld [vmem:[#allocation2 + $0x8] sm:$0xff]  ;;  %vm56_vm1 = vcmask 130048  }
  0x27   :  { %442 = vmatprep.subr.bf16.mxu1 %v549_v0  ;;  %401 = vmatprep.mubr.msk.f32.mxu1 %vm550_vm0, %v551_v1  ;;  %v440_v4 = vpack.c.bf16 %v50_v3, %v49_v2  ;;  %v133_v7 = vld [vmem:[#allocation2 + $0x10] sm:$0xff]  ;;  %v443_v8 = vpack.c.bf16 %v132_v6, %v131_v5  ;;  %v134_v9 = vld [vmem:[#allocation2 + $0x18] sm:$0xff]  ;;  %v135_v12 = vld [vmem:[#allocation2 + $0x20] sm:$0xff] }
  0x28   :  { %v48_v10 = vld [vmem:[%s647_s0] sm:$0xff]  ;;  %v446_v11 = vpack.c.bf16 %v134_v9, %v133_v7  ;;  %v136_v13 = vld [vmem:[#allocation2 + $0x28] sm:$0xff]  ;;  %v138_v16 = vld [vmem:[#allocation2 + $0x38] sm:$0xff] }
  0x29   :  { %441 = vmatpush3.bf16.msra.mxu0 %v440_v4  ;;  %444 = vmatpush3.bf16.msra.mxu1 %v443_v8  ;;  %v449_v14 = vpack.c.bf16 %v136_v13, %v135_v12  ;;  %v137_v15 = vld [vmem:[#allocation2 + $0x30] sm:$0xff]  ;;  %v139_v18 = vld [vmem:[#allocation2 + $0x40] sm:$0xff]  ;;  %v140_v19 = vld [vmem:[#allocation2 + $0x48] sm:$0xff] }
  0x2a   :  { %466 = vmatprep.subr.bf16.mxu0 %v549_v0  ;;  %445 = vmatprep.subr.bf16.mxu1 %v549_v0  ;;  %v452_v17 = vpack.c.bf16 %v138_v16, %v137_v15  ;;  %v455_v20 = vpack.c.bf16 %v140_v19, %v139_v18  ;;  %v141_v21 = vld [vmem:[#allocation2 + $0x50] sm:$0xff]  ;;  %v142_v22 = vld [vmem:[#allocation2 + $0x58] sm:$0xff]  ;;  %v143_v24 = vld [vmem:[#allocation2 + $0x60] sm:$0xff] }
  0x2b   :  { %v458_v23 = vpack.c.bf16 %v142_v22, %v141_v21  ;;  %v144_v25 = vld [vmem:[#allocation2 + $0x68] sm:$0xff]  ;;  %v145_v27 = vld [vmem:[#allocation2 + $0x70] sm:$0xff]  ;;  %v146_v28 = vld [vmem:[#allocation2 + $0x78] sm:$0xff] }
  0x2c   :  { %367 = vmatmul.mubr.msk.f32.vlgmr.msra.gmra.mrb[0].mxu0 %vm56_vm1, %v48_v10  ;;  %v461_v26 = vpack.c.bf16 %v144_v25, %v143_v24  ;;  %v464_v29 = vpack.c.bf16 %v146_v28, %v145_v27  ;;  %v223_v30 = vld [vmem:[#allocation4] sm:$0xff]  ;;  %v224_v31 = vld [vmem:[#allocation4 + $0x8] sm:$0xff]  ;;  %v225_v32 = vld [vmem:[#allocation4 + $0x10] sm:$0xff] }
  0x2d   :  { %436 = vmatprep.mubr.msk.f32.mxu0 %vm550_vm0, %v551_v1  ;;  %447 = vmatpush3.bf16.msra.mxu1 %v446_v11  ;;  %v467_v33 = vpack.c.bf16 %v224_v31, %v223_v30  ;;  %v226_v34 = vld [vmem:[#allocation4 + $0x18] sm:$0xff]  ;;  %v227_v36 = vld [vmem:[#allocation4 + $0x20] sm:$0xff]  ;;  %v228_v37 = vld [vmem:[#allocation4 + $0x28] sm:$0xff] }
  0x2e   :  { %448 = vmatprep.subr.bf16.mxu1 %v549_v0  ;;  %v470_v35 = vpack.c.bf16 %v226_v34, %v225_v32  ;;  %v473_v38 = vpack.c.bf16 %v228_v37, %v227_v36  ;;  %v229_v39 = vld [vmem:[#allocation4 + $0x30] sm:$0xff]  ;;  %v230_v40 = vld [vmem:[#allocation4 + $0x38] sm:$0xff]  ;;  %v231_v42 = vld [vmem:[#allocation4 + $0x40] sm:$0xff] }
  0x2f   :  { %468 = vmatpush3.bf16.msra.mxu0 %v467_v33  ;;  %v476_v41 = vpack.c.bf16 %v230_v40, %v229_v39  ;;  %v232_v43 = vld [vmem:[#allocation4 + $0x48] sm:$0xff]  ;;  %v233_v45 = vld [vmem:[#allocation4 + $0x50] sm:$0xff]  ;;  %v234_v46 = vld [vmem:[#allocation4 + $0x58] sm:$0xff] }
  0x30   :  { %469 = vmatprep.subr.bf16.mxu0 %v549_v0  ;;  %v479_v44 = vpack.c.bf16 %v232_v43, %v231_v42  ;;  %v482_v47 = vpack.c.bf16 %v234_v46, %v233_v45  ;;  %v235_v48 = vld [vmem:[#allocation4 + $0x60] sm:$0xff]  ;;  %v236_v49 = vld [vmem:[#allocation4 + $0x68] sm:$0xff]  ;;  %v321_v51 = vld [vmem:[%s651_s4] ss:$0 sm:$0xff] }
  0x31   :  { %450 = vmatpush3.bf16.msra.mxu1 %v449_v14  ;;  %v485_v50 = vpack.c.bf16 %v236_v49, %v235_v48  ;;  %v237_v56 = vld [vmem:[#allocation4 + $0x70] sm:$0xff]  ;;  %v238_v57 = vld [vmem:[#allocation4 + $0x78] sm:$0xff] }
  0x32   :  { %451 = vmatprep.subr.bf16.mxu1 %v549_v0  ;;  %v488_v58 = vpack.c.bf16 %v238_v57, %v237_v56  ;;  %v323_v59 = vld [vmem:[%s651_s4 + $0x1] ss:$0 sm:$0xff] }
  0x33   :  { %471 = vmatpush3.bf16.msra.mxu0 %v470_v35 }
  0x34   :  { %472 = vmatprep.subr.bf16.mxu0 %v549_v0 }
  0x35   :  { %453 = vmatpush3.bf16.msra.mxu1 %v452_v17 }
  0x36   :  { %454 = vmatprep.subr.bf16.mxu1 %v549_v0 }
  0x37   :  { %474 = vmatpush3.bf16.msra.mxu0 %v473_v38 }
  0x38   :  { %475 = vmatprep.subr.bf16.mxu0 %v549_v0 }
  0x39   :  { %456 = vmatpush3.bf16.msra.mxu1 %v455_v20 }
  0x3a   :  { %457 = vmatprep.subr.bf16.mxu1 %v549_v0 }
  0x3b   :  { %477 = vmatpush3.bf16.msra.mxu0 %v476_v41 }
  0x3c   :  { %478 = vmatprep.subr.bf16.mxu0 %v549_v0 }
  0x3d   :  { %459 = vmatpush3.bf16.msra.mxu1 %v458_v23 }
  0x3e   :  { %460 = vmatprep.subr.bf16.mxu1 %v549_v0 }
  0x3f   :  { %480 = vmatpush3.bf16.msra.mxu0 %v479_v44 }
  0x40   :  { %481 = vmatprep.subr.bf16.mxu0 %v549_v0 }
  0x41   :  { %462 = vmatpush3.bf16.msra.mxu1 %v461_v26 }
  0x42   :  { %463 = vmatprep.subr.bf16.mxu1 %v549_v0 }
  0x43   :  { %483 = vmatpush3.bf16.msra.mxu0 %v482_v47 }
  0x44   :  { %484 = vmatprep.subr.bf16.mxu0 %v549_v0 }
  0x45   :  { %465 = vmatpush3.bf16.msra.mxu1 %v464_v29 }
  0x47   :  { %486 = vmatpush3.bf16.msra.mxu0 %v485_v50 }
  0x48   :  { %487 = vmatprep.subr.bf16.mxu0 %v549_v0  ;;  %v324_v0 = vld [vmem:[%s651_s4 + $0x2] ss:$0 sm:$0xff] }
  0x4b   :  { %489 = vmatpush3.bf16.msra.mxu0 %v488_v58 }
  0xff   :  { %v126_v52 = vpop.f32.mrb[0].mxu0 }
 0x100   :  { %v127_v53 = vadd.f32 %v321_v51, %v126_v52  ;;  %v368_v54 = vpop.f32.mrb[1].mxu0 }
 0x102   :  { %v130_v55 = vmax.f32 %v127_v53, 0.0 }
 0x104   :  { %402 = vmatmul.mubr.f32.vlgmr.msra.gmra.mrb[0].mxu1 %v130_v55 }
 0x1d7   :  { %v218_v60 = vpop.f32.mrb[0].mxu1 }
 0x1d8   :  { %v219_v61 = vadd.f32 %v323_v59, %v218_v60  ;;  %v403_v62 = vpop.f32.mrb[1].mxu1 }
 0x1da   :  { %v222_v63 = vmax.f32 %v219_v61, 0.0 }
 0x1dc   :  { %437 = vmatmul.mubr.f32.vlgmr.msra.gmra.mrb[2].mxu0 %v222_v63 }
 0x2af   :  { %v310_v1 = vpop.f32.mrb[2].mxu0 }
 0x2b0   :  { %v311_v2 = vadd.f32 %v324_v0, %v310_v1  ;;  %v438_v3 = vpop.f32.mrb[3].mxu0 }
 0x2b2   :  { %314 = vst [vmem:[%s652_s5] sm:$0xff] %v311_v2 }
 0x2b3   :  { %319 = vsyncpa [#allocation3], 1 }
 0x2b4   :  { %320 = vsyncpa [#allocation5], 1 }

</bundles_post_ra>
